<compile_context>
chip_gen: v7x
topology: tpu7x:2x2x1
jax: 0.10.0
libtpu: 0.0.40
codegen_flags: <defaults>
</compile_context>

<pallas_src>
import functools

import jax
import jax.numpy as jnp
from jax import lax
from jax.experimental import pallas as pl
from jax.experimental.pallas import tpu as pltpu


def _dropout_kernel(seed_ref, x_ref, o_ref, *, threshold: int, scale: float,
                    block_rows: int, width: int):
    shape = x_ref.shape  # (block_rows, width)

    # Global element index (counter) for every lane of this block.
    pid = pl.program_id(0).astype(jnp.uint32)
    row = lax.broadcasted_iota(jnp.int32, shape, 0).astype(jnp.uint32)
    col = lax.broadcasted_iota(jnp.int32, shape, 1).astype(jnp.uint32)
    gidx = (row + pid * jnp.uint32(block_rows)) * jnp.uint32(width) + col

    # Mix in the seed and hash (lowbias32 finalizer): good avalanche, pure VPU
    # integer ops, identical randoms regardless of tiling.
    seed_u = seed_ref[0].astype(jnp.uint32)
    h = gidx ^ (seed_u * jnp.uint32(0x9E3779B9))
    h ^= h >> 16
    h *= jnp.uint32(0x7FEB352D)
    h ^= h >> 15
    h *= jnp.uint32(0x846CA68B)
    h ^= h >> 16

    # Keep with probability 1 - p  (threshold = round(p * 2^32)).
    keep = h >= jnp.uint32(threshold)

    x = x_ref[...]
    o_ref[...] = jnp.where(keep, x * scale, jnp.zeros_like(x))


def _choose_layout(n: int, itemsize: int):
    """Pick a lane-dense 2D layout (rows_padded, width) and a block row count."""
    lane = 128
    max_width = 2048  # wide multiple-of-128 last dim -> unmasked full-width stores
    if n <= max_width:
        width = ((n + lane - 1) // lane) * lane
    else:
        width = max_width
    rows = -(-n // width)  # ceil

    # Minimum sublane packing per dtype: f32 -> 8, bf16 -> 16, int8/fp8 -> 32.
    pack = max(8, 32 // itemsize)

    # Target ~2 MiB per block buffer: amortizes the ~0.35us per-step overhead
    # while keeping double-buffered in+out plus integer temporaries well under
    # every generation's scoped VMEM.
    target_rows = max(pack, (2 * 1024 * 1024) // (width * itemsize))
    target_rows = (target_rows // pack) * pack

    if rows <= target_rows:
        block_rows = rows           # full-dim block: always a legal block shape
        rows_padded = rows
    else:
        block_rows = target_rows    # multiple of the sublane packing
        rows_padded = -(-rows // block_rows) * block_rows
    return width, rows_padded, block_rows


def pallas_dropout(x, p: float = 0.1, training: bool = True, seed: int = 0):
    """Dropout forward matching the PyTorch module's semantics."""
    assert 0.0 <= p <= 1.0, f"[ERROR] Invalid value of dropout! {p}"
    if (not training) or p == 0.0:
        return x                      # identity path, no kernel needed
    if p == 1.0:
        return jnp.zeros_like(x)      # mask is all-false -> x * mask == 0

    orig_shape = x.shape
    n = x.size
    itemsize = jnp.dtype(x.dtype).itemsize

    width, rows_padded, block_rows = _choose_layout(n, itemsize)
    total = rows_padded * width

    x_flat = x.reshape(-1)
    if total != n:  # pad only when actually needed (not for the 2x4x16x16 case)
        x_flat = jnp.pad(x_flat, (0, total - n))
    x2d = x_flat.reshape(rows_padded, width)

    threshold = min(int(round(p * (2.0 ** 32))), 2 ** 32 - 1)
    scale = 1.0 / (1.0 - p)
    grid = (rows_padded // block_rows,)
    seed_arr = jnp.array([seed], dtype=jnp.int32)

    out2d = pl.pallas_call(
        functools.partial(_dropout_kernel, threshold=threshold, scale=scale,
                          block_rows=block_rows, width=width),
        out_shape=jax.ShapeDtypeStruct((rows_padded, width), x.dtype),
        grid_spec=pltpu.PrefetchScalarGridSpec(
            num_scalar_prefetch=1,
            grid=grid,
            in_specs=[pl.BlockSpec((block_rows, width), lambda i, seed: (i, 0))],
            out_specs=pl.BlockSpec((block_rows, width), lambda i, seed: (i, 0)),
        ),
        compiler_params=pltpu.CompilerParams(
            dimension_semantics=("parallel",),
            vmem_limit_bytes=32 * 1024 * 1024,
        ),
    )(seed_arr, x2d)

    out_flat = out2d.reshape(-1)
    if total != n:
        out_flat = out_flat[:n]
    return out_flat.reshape(orig_shape)


if __name__ == "__main__":
    key = jax.random.PRNGKey(0)
    # NCHW input, small shape consistent with a conv-style activation.
    x = jax.random.normal(key, (2, 4, 16, 16), dtype=jnp.float32)

    p = 0.1
    y = jax.block_until_ready(pallas_dropout(x, p=p, training=True, seed=1234))

    # Shape/dtype preserved.
    assert y.shape == x.shape and y.dtype == x.dtype

    # Every element is either dropped (0) or scaled by exactly 1/(1-p).
    scale = 1.0 / (1.0 - p)
    dropped = (y == 0)
    kept_ok = jnp.isclose(y, x * scale, rtol=1e-5, atol=1e-6)
    assert bool(jnp.all(dropped | kept_ok))

    # Empirical drop fraction close to p.
    drop_frac = float(jnp.mean(dropped.astype(jnp.float32)))
    assert abs(drop_frac - p) < 0.07, f"drop fraction {drop_frac} vs p={p}"

    # Eval-mode path is identity.
    y_eval = jax.block_until_ready(pallas_dropout(x, p=p, training=False))
    assert jnp.array_equal(y_eval, x)

    # p == 1 drops everything (matches PyTorch x * all-false mask).
    y_one = jax.block_until_ready(pallas_dropout(x, p=1.0, training=True))
    assert bool(jnp.all(y_one == 0))

    print("KERNEL_OK")
</pallas_src>

<mosaic_0001>
module attributes {stable_mosaic.version = 11 : i64} {
  func.func @_dropout_kernel(%arg0: i32, %arg1: memref<1xi32, #tpu.memory_space<smem>>, %arg2: memref<1x2048xf32, #tpu.memory_space<vmem>>, %arg3: memref<1x2048xf32, #tpu.memory_space<vmem>>) attributes {dimension_semantics = [#tpu.dimension_semantics<parallel>], iteration_bounds = array<i64: 1>, scalar_prefetch = 1 : i64, scratch_operands = 0 : i64, tpu.core_type = #tpu.core_type<tc>, window_params = [{transform_indices = @transform_0, window_bounds = array<i64: 1, 2048>}, {transform_indices = @transform_1, window_bounds = array<i64: 1, 2048>}]} {
    %0 = tpu.iota {dimensions = array<i32: 0>} : vector<1x2048xi32>
    %1 = tpu.iota {dimensions = array<i32: 1>} : vector<1x2048xi32>
    %c1_i32 = arith.constant 1 : i32
    %2 = arith.muli %arg0, %c1_i32 : i32
    %3 = vector.broadcast %2 : i32 to vector<1x2048xi32>
    %4 = arith.addi %0, %3 : vector<1x2048xi32>
    %c2048_i32 = arith.constant 2048 : i32
    %5 = vector.broadcast %c2048_i32 : i32 to vector<1x2048xi32>
    %6 = arith.muli %4, %5 : vector<1x2048xi32>
    %7 = arith.addi %6, %1 : vector<1x2048xi32>
    %c0 = arith.constant 0 : index
    %8 = memref.load %arg1[%c0] : memref<1xi32, #tpu.memory_space<smem>>
    %c-1640531527_i32 = arith.constant -1640531527 : i32
    %9 = arith.muli %8, %c-1640531527_i32 : i32
    %10 = vector.broadcast %9 : i32 to vector<1x2048xi32>
    %11 = arith.xori %7, %10 : vector<1x2048xi32>
    %c16_i32 = arith.constant 16 : i32
    %12 = vector.broadcast %c16_i32 : i32 to vector<1x2048xi32>
    %13 = arith.shrui %11, %12 : vector<1x2048xi32>
    %14 = arith.xori %11, %13 : vector<1x2048xi32>
    %c2146121005_i32 = arith.constant 2146121005 : i32
    %15 = vector.broadcast %c2146121005_i32 : i32 to vector<1x2048xi32>
    %16 = arith.muli %14, %15 : vector<1x2048xi32>
    %c15_i32 = arith.constant 15 : i32
    %17 = vector.broadcast %c15_i32 : i32 to vector<1x2048xi32>
    %18 = arith.shrui %16, %17 : vector<1x2048xi32>
    %19 = arith.xori %16, %18 : vector<1x2048xi32>
    %c-2073254261_i32 = arith.constant -2073254261 : i32
    %20 = vector.broadcast %c-2073254261_i32 : i32 to vector<1x2048xi32>
    %21 = arith.muli %19, %20 : vector<1x2048xi32>
    %c16_i32_0 = arith.constant 16 : i32
    %22 = vector.broadcast %c16_i32_0 : i32 to vector<1x2048xi32>
    %23 = arith.shrui %21, %22 : vector<1x2048xi32>
    %24 = arith.xori %21, %23 : vector<1x2048xi32>
    %c429496730_i32 = arith.constant 429496730 : i32
    %25 = vector.broadcast %c429496730_i32 : i32 to vector<1x2048xi32>
    %26 = arith.cmpi uge, %24, %25 : vector<1x2048xi32>
    %c0_1 = arith.constant 0 : index
    %c0_2 = arith.constant 0 : index
    %27 = vector.load %arg2[%c0_1, %c0_2] : memref<1x2048xf32, #tpu.memory_space<vmem>>, vector<1x2048xf32>
    %cst = arith.constant 1.11111116 : f32
    %28 = vector.broadcast %cst : f32 to vector<1x2048xf32>
    %29 = arith.mulf %27, %28 : vector<1x2048xf32>
    %cst_3 = arith.constant 0.000000e+00 : f32
    %30 = vector.broadcast %cst_3 : f32 to vector<1x2048xf32>
    %31 = arith.select %26, %29, %30 : vector<1x2048xi1>, vector<1x2048xf32>
    %c0_4 = arith.constant 0 : index
    %c0_5 = arith.constant 0 : index
    %32 = vector.load %arg3[%c0_4, %c0_5] : memref<1x2048xf32, #tpu.memory_space<vmem>>, vector<1x2048xf32>
    tpu.vector_store %arg3[%c0_4, %c0_5], %31 {strides = array<i32>} : memref<1x2048xf32, #tpu.memory_space<vmem>>, vector<1x2048xf32>,
    return
  }
  func.func @transform_0(%arg0: i32, %arg1: memref<1xi32, #tpu.memory_space<smem>>) -> (i32, i32) {
    %c0_i32 = arith.constant 0 : i32
    %c0_i32_0 = arith.constant 0 : i32
    return %arg0, %c0_i32 : i32, i32
  }
  func.func @transform_1(%arg0: i32, %arg1: memref<1xi32, #tpu.memory_space<smem>>) -> (i32, i32) {
    %c0_i32 = arith.constant 0 : i32
    %c0_i32_0 = arith.constant 0 : i32
    return %arg0, %c0_i32 : i32, i32
  }
}

</mosaic_0001>

<bundles_post_ra>
// kernel: tpu_custom_call.1
= control target key start
LH: loop header
LB: loop body
LE: loop exit
PB: predicated region body
PF: predicated region fallthrough
CT: control target
= control target key end

     0   :  { %8 = vsyncpa [#allocation5], 0  ;;  %s644_s0 = inlined_call_operand.<no memory space> [shape: s32[1], index: 0, kind: input, shape index: {}]   ;;  %s645_s1 = inlined_call_operand.hbm [shape: f32[1,2048], index: 1, kind: input, shape index: {}]   ;;  %s646_s2 = inlined_call_operand.hbm [shape: f32[1,2048], index: 2, kind: output, shape index: {}]  }
   0x1   :  { %9 = vsyncpa [#allocation6], 0  ;;  %s510_s9 = smov [#allocation4]   ;;  %s462_s13 = scalar_lea.hbm %s645_s1, 256 }
   0x2   :  { %s16_s10 = sshll.u32 %s510_s9, 4  ;;  %p463_p0 = scmp.ne.s32.totalorder %s645_s1, %s462_s13  ;;  %s17_s10 = int_to_ptr.vmem [resolvable:$true] %s16_s10 }
   0x3   :  { %p466_p1 = scmp.lt.u32.totalorder %s462_s13, %s645_s1 }
   0x5   :  { %p468_p2 = pnand %p466_p1, %p463_p0 }
   0x7   :  { %471 = shalt.err (!%p468_p2)
}
   0x8   :  { %s472_s18 = scalar_lea.vmem %s17_s10, 256  ;;  %p477_p4 = scmp.lt.s32.totalorder %s17_s10, %s17_s10 }
   0x9   :  { %p473_p3 = scmp.ne.s32.totalorder %s17_s10, %s472_s18  ;;  %p478_p5 = scmp.lt.s32.totalorder %s472_s18, %s472_s18 }
   0xb   :  { %p479_p6 = por %p478_p5, %p477_p4 }
   0xd   :  { %p480_p7 = pnand %p479_p6, %p473_p3 }
   0xf   :  { %483 = shalt.err (!%p480_p7)
}
  0x10   :  { %19 = dma.hbm_to_vmem [thread:$0]  %s645_s1, 256, %s17_s10, [#allocation5]  }
  0x11   :  { %506 = dma.done.wait [#allocation5], 256  }
  0x12   :  { %507 = vsyncadd [#allocation5], 4294967040  ;;  %v23_v0 = vlaneseq  ;;  %s62_s23 = smul.u32 2654435769, %s644_s0  ;;  %v511_v1 = vmov 1966171168  }
  0x13   :  { %v543_v2 = vunpack.c.l.s4 %v511_v1  ;;  %v224_v23 = vld [vmem:[#allocation4] sm:$0xff]  ;;  %v225_v24 = vld [vmem:[#allocation4 + $0x8] sm:$0xff]  ;;  %s512_s0 = smov [#allocation7]  }
  0x14   :  { %v26_v3 = vand.u32 127, %v23_v0  ;;  %v545_v4 = vshrl.u32 %v23_v0, 7  ;;  %v63_v5 = vstv %s62_s23  ;;  %v549_v25 = vmul.f32 1.1111112, %v224_v23  ;;  %s450_s1 = sshll.u32 %s512_s0, 4  ;;  %s451_s1 = int_to_ptr.vmem [resolvable:$true] %s450_s1 }
  0x15   :  { %v348_v6 = vunpack.c.0.s8 %v543_v2  ;;  %v551_v26 = vmul.f32 1.1111112, %v225_v24  ;;  %s484_s24 = scalar_lea.vmem %s451_s1, 256  ;;  %p489_p9 = scmp.lt.s32.totalorder %s451_s1, %s451_s1 }
  0x16   :  { %v27_v7 = vadd.s32 128, %v26_v3  ;;  %v28_v8 = vadd.s32 256, %v26_v3  ;;  %v29_v9 = vadd.s32 384, %v26_v3  ;;  %v30_v10 = vadd.s32 512, %v26_v3  ;;  %p485_p8 = scmp.ne.s32.totalorder %s451_s1, %s484_s24  ;;  %p490_p10 = scmp.lt.s32.totalorder %s484_s24, %s484_s24 }
  0x17   :  { %v31_v11 = vadd.s32 640, %v26_v3  ;;  %v32_v12 = vadd.s32 768, %v26_v3  ;;  %v33_v13 = vadd.s32 896, %v26_v3  ;;  %v34_v14 = vadd.s32 1024, %v26_v3 }
  0x18   :  { %v35_v15 = vadd.s32 1152, %v26_v3  ;;  %v36_v16 = vadd.s32 1280, %v26_v3  ;;  %v37_v17 = vadd.s32 1408, %v26_v3  ;;  %v38_v18 = vadd.s32 1536, %v26_v3  ;;  %p491_p11 = por %p490_p10, %p489_p9 }
  0x19   :  { %v39_v19 = vadd.s32 1664, %v26_v3  ;;  %v40_v20 = vadd.s32 1792, %v26_v3  ;;  %v41_v21 = vadd.s32 1920, %v26_v3  ;;  %v44_v22 = vmul.u32 2048, %v545_v4 }
  0x1a   :  { %v232_v27 = vsub.s32 0, %v545_v4  ;;  %v236_v28 = vsub.s32 1, %v545_v4  ;;  %p492_p12 = pnand %p491_p11, %p485_p8 }
  0x1b   :  { %v45_v29 = vadd.s32 %v44_v22, %v26_v3  ;;  %v46_v30 = vadd.s32 %v44_v22, %v27_v7  ;;  %v47_v31 = vadd.s32 %v44_v22, %v28_v8  ;;  %v48_v32 = vadd.s32 %v44_v22, %v29_v9 }
  0x1c   :  { %v49_v33 = vadd.s32 %v44_v22, %v30_v10  ;;  %v50_v34 = vadd.s32 %v44_v22, %v31_v11  ;;  %v51_v35 = vadd.s32 %v44_v22, %v32_v12  ;;  %v52_v36 = vadd.s32 %v44_v22, %v33_v13 }
  0x1d   :  { %v53_v37 = vadd.s32 %v44_v22, %v34_v14  ;;  %v54_v38 = vadd.s32 %v44_v22, %v35_v15  ;;  %v55_v39 = vadd.s32 %v44_v22, %v36_v16  ;;  %v56_v40 = vadd.s32 %v44_v22, %v37_v17 }
  0x1e   :  { %v57_v41 = vadd.s32 %v44_v22, %v38_v18  ;;  %v58_v42 = vadd.s32 %v44_v22, %v39_v19  ;;  %v59_v43 = vadd.s32 %v44_v22, %v40_v20  ;;  %v60_v44 = vadd.s32 %v44_v22, %v41_v21 }
  0x1f   :  { %v64_v45 = vxor.u32 %v63_v5, %v45_v29  ;;  %v65_v46 = vxor.u32 %v63_v5, %v46_v30  ;;  %v66_v47 = vxor.u32 %v63_v5, %v47_v31  ;;  %v67_v48 = vxor.u32 %v63_v5, %v48_v32 }
  0x20   :  { %v68_v49 = vxor.u32 %v63_v5, %v49_v33  ;;  %v69_v50 = vxor.u32 %v63_v5, %v50_v34  ;;  %v70_v51 = vxor.u32 %v63_v5, %v51_v35  ;;  %v71_v52 = vxor.u32 %v63_v5, %v52_v36 }
  0x21   :  { %v72_v53 = vxor.u32 %v63_v5, %v53_v37  ;;  %v73_v54 = vxor.u32 %v63_v5, %v54_v38  ;;  %v74_v55 = vxor.u32 %v63_v5, %v55_v39  ;;  %v75_v56 = vxor.u32 %v63_v5, %v56_v40 }
  0x22   :  { %v76_v57 = vxor.u32 %v63_v5, %v57_v41  ;;  %v77_v58 = vxor.u32 %v63_v5, %v58_v42  ;;  %v78_v59 = vxor.u32 %v63_v5, %v59_v43  ;;  %v79_v60 = vxor.u32 %v63_v5, %v60_v44 }
  0x23   :  { %v80_v61 = vshrl.u32 %v64_v45, 16  ;;  %v81_v62 = vshrl.u32 %v65_v46, 16  ;;  %v82_v63 = vshrl.u32 %v66_v47, 16  ;;  %v83_v0 = vshrl.u32 %v67_v48, 16 }
  0x24   :  { %v84_v1 = vshrl.u32 %v68_v49, 16  ;;  %v85_v3 = vshrl.u32 %v69_v50, 16  ;;  %v86_v7 = vshrl.u32 %v70_v51, 16  ;;  %v87_v8 = vshrl.u32 %v71_v52, 16 }
  0x25   :  { %v88_v9 = vshrl.u32 %v72_v53, 16  ;;  %v89_v10 = vshrl.u32 %v73_v54, 16  ;;  %v90_v11 = vshrl.u32 %v74_v55, 16  ;;  %v91_v12 = vshrl.u32 %v75_v56, 16 }
  0x26   :  { %v92_v13 = vshrl.u32 %v76_v57, 16  ;;  %v93_v14 = vshrl.u32 %v77_v58, 16  ;;  %v94_v15 = vshrl.u32 %v78_v59, 16  ;;  %v95_v16 = vshrl.u32 %v79_v60, 16 }
  0x27   :  { %v96_v17 = vxor.u32 %v80_v61, %v64_v45  ;;  %v97_v18 = vxor.u32 %v81_v62, %v65_v46  ;;  %v98_v19 = vxor.u32 %v82_v63, %v66_v47  ;;  %v99_v5 = vxor.u32 %v83_v0, %v67_v48 }
  0x28   :  { %v100_v20 = vxor.u32 %v84_v1, %v68_v49  ;;  %v101_v21 = vxor.u32 %v85_v3, %v69_v50  ;;  %v102_v22 = vxor.u32 %v86_v7, %v70_v51  ;;  %v103_v23 = vxor.u32 %v87_v8, %v71_v52 }
  0x29   :  { %v104_v24 = vxor.u32 %v88_v9, %v72_v53  ;;  %v105_v29 = vxor.u32 %v89_v10, %v73_v54  ;;  %v106_v30 = vxor.u32 %v90_v11, %v74_v55  ;;  %v107_v31 = vxor.u32 %v91_v12, %v75_v56 }
  0x2a   :  { %v108_v32 = vxor.u32 %v92_v13, %v76_v57  ;;  %v109_v33 = vxor.u32 %v93_v14, %v77_v58  ;;  %v110_v34 = vxor.u32 %v94_v15, %v78_v59  ;;  %v111_v35 = vxor.u32 %v95_v16, %v79_v60 }
  0x2b   :  { %v112_v36 = vmul.u32 2146121005, %v96_v17  ;;  %v113_v37 = vmul.u32 2146121005, %v97_v18  ;;  %v558_v38 = vrot.slane %v549_v25, %v232_v27  ;;  %v563_v39 = vrot.slane %v549_v25, %v236_v28 }
  0x2c   :  { %v114_v40 = vmul.u32 2146121005, %v98_v19  ;;  %v115_v41 = vmul.u32 2146121005, %v99_v5  ;;  %v240_v42 = vsub.s32 2, %v545_v4  ;;  %v244_v43 = vsub.s32 3, %v545_v4 }
  0x2d   :  { %v116_v44 = vmul.u32 2146121005, %v100_v20  ;;  %v117_v45 = vmul.u32 2146121005, %v101_v21  ;;  %v128_v46 = vshrl.u32 %v112_v36, 15  ;;  %v129_v47 = vshrl.u32 %v113_v37, 15 }
  0x2e   :  { %v118_v48 = vmul.u32 2146121005, %v102_v22  ;;  %v119_v49 = vmul.u32 2146121005, %v103_v23  ;;  %v130_v50 = vshrl.u32 %v114_v40, 15  ;;  %v131_v51 = vshrl.u32 %v115_v41, 15 }
  0x2f   :  { %v120_v52 = vmul.u32 2146121005, %v104_v24  ;;  %v121_v53 = vmul.u32 2146121005, %v105_v29  ;;  %v132_v54 = vshrl.u32 %v116_v44, 15  ;;  %v133_v55 = vshrl.u32 %v117_v45, 15 }
  0x30   :  { %v122_v56 = vmul.u32 2146121005, %v106_v30  ;;  %v123_v57 = vmul.u32 2146121005, %v107_v31  ;;  %v134_v58 = vshrl.u32 %v118_v48, 15  ;;  %v135_v59 = vshrl.u32 %v119_v49, 15 }
  0x31   :  { %v124_v60 = vmul.u32 2146121005, %v108_v32  ;;  %v125_v61 = vmul.u32 2146121005, %v109_v33  ;;  %v136_v62 = vshrl.u32 %v120_v52, 15  ;;  %v137_v63 = vshrl.u32 %v121_v53, 15 }
  0x32   :  { %v126_v0 = vmul.u32 2146121005, %v110_v34  ;;  %v127_v1 = vmul.u32 2146121005, %v111_v35  ;;  %v138_v3 = vshrl.u32 %v122_v56, 15  ;;  %v139_v7 = vshrl.u32 %v123_v57, 15 }
  0x33   :  { %v140_v8 = vshrl.u32 %v124_v60, 15  ;;  %v141_v9 = vshrl.u32 %v125_v61, 15  ;;  %v144_v10 = vxor.u32 %v128_v46, %v112_v36  ;;  %v145_v11 = vxor.u32 %v129_v47, %v113_v37 }
  0x34   :  { %v142_v12 = vshrl.u32 %v126_v0, 15  ;;  %v143_v13 = vshrl.u32 %v127_v1, 15  ;;  %v146_v14 = vxor.u32 %v130_v50, %v114_v40  ;;  %v147_v15 = vxor.u32 %v131_v51, %v115_v41 }
  0x35   :  { %v148_v16 = vxor.u32 %v132_v54, %v116_v44  ;;  %v149_v17 = vxor.u32 %v133_v55, %v117_v45  ;;  %v150_v18 = vxor.u32 %v134_v58, %v118_v48  ;;  %v151_v19 = vxor.u32 %v135_v59, %v119_v49 }
  0x36   :  { %v152_v5 = vxor.u32 %v136_v62, %v120_v52  ;;  %v153_v20 = vxor.u32 %v137_v63, %v121_v53  ;;  %v154_v21 = vxor.u32 %v138_v3, %v122_v56  ;;  %v155_v22 = vxor.u32 %v139_v7, %v123_v57 }
  0x37   :  { %v156_v23 = vxor.u32 %v140_v8, %v124_v60  ;;  %v157_v24 = vxor.u32 %v141_v9, %v125_v61  ;;  %v158_v29 = vxor.u32 %v142_v12, %v126_v0  ;;  %v159_v30 = vxor.u32 %v143_v13, %v127_v1 }
  0x38   :  { %v160_v31 = vmul.u32 2221713035, %v144_v10  ;;  %v161_v32 = vmul.u32 2221713035, %v145_v11  ;;  %v570_v33 = vrot.slane %v549_v25, %v240_v42  ;;  %v575_v34 = vrot.slane %v549_v25, %v244_v43 }
  0x39   :  { %v162_v35 = vmul.u32 2221713035, %v146_v14  ;;  %v163_v36 = vmul.u32 2221713035, %v147_v15  ;;  %v248_v37 = vsub.s32 4, %v545_v4  ;;  %v252_v40 = vsub.s32 5, %v545_v4 }
  0x3a   :  { %v164_v41 = vmul.u32 2221713035, %v148_v16  ;;  %v165_v44 = vmul.u32 2221713035, %v149_v17  ;;  %v176_v45 = vshrl.u32 %v160_v31, 16  ;;  %v177_v46 = vshrl.u32 %v161_v32, 16 }
  0x3b   :  { %v166_v47 = vmul.u32 2221713035, %v150_v18  ;;  %v167_v48 = vmul.u32 2221713035, %v151_v19  ;;  %v178_v49 = vshrl.u32 %v162_v35, 16  ;;  %v179_v50 = vshrl.u32 %v163_v36, 16 }
  0x3c   :  { %v168_v51 = vmul.u32 2221713035, %v152_v5  ;;  %v169_v52 = vmul.u32 2221713035, %v153_v20  ;;  %v180_v53 = vshrl.u32 %v164_v41, 16  ;;  %v181_v54 = vshrl.u32 %v165_v44, 16 }
  0x3d   :  { %v170_v55 = vmul.u32 2221713035, %v154_v21  ;;  %v171_v56 = vmul.u32 2221713035, %v155_v22  ;;  %v182_v57 = vshrl.u32 %v166_v47, 16  ;;  %v183_v58 = vshrl.u32 %v167_v48, 16 }
  0x3e   :  { %v172_v59 = vmul.u32 2221713035, %v156_v23  ;;  %v173_v60 = vmul.u32 2221713035, %v157_v24  ;;  %v184_v61 = vshrl.u32 %v168_v51, 16  ;;  %v185_v62 = vshrl.u32 %v169_v52, 16 }
  0x3f   :  { %v174_v63 = vmul.u32 2221713035, %v158_v29  ;;  %v175_v0 = vmul.u32 2221713035, %v159_v30  ;;  %v186_v1 = vshrl.u32 %v170_v55, 16  ;;  %v187_v3 = vshrl.u32 %v171_v56, 16 }
  0x40   :  { %v188_v7 = vshrl.u32 %v172_v59, 16  ;;  %v189_v8 = vshrl.u32 %v173_v60, 16  ;;  %v192_v9 = vxor.u32 %v176_v45, %v160_v31  ;;  %v193_v10 = vxor.u32 %v177_v46, %v161_v32 }
  0x41   :  { %v190_v11 = vshrl.u32 %v174_v63, 16  ;;  %v191_v12 = vshrl.u32 %v175_v0, 16  ;;  %v194_v13 = vxor.u32 %v178_v49, %v162_v35  ;;  %v195_v14 = vxor.u32 %v179_v50, %v163_v36 }
  0x42   :  { %v196_v15 = vxor.u32 %v180_v53, %v164_v41  ;;  %v197_v16 = vxor.u32 %v181_v54, %v165_v44  ;;  %v198_v17 = vxor.u32 %v182_v57, %v166_v47  ;;  %v199_v18 = vxor.u32 %v183_v58, %v167_v48 }
  0x43   :  { %v200_v19 = vxor.u32 %v184_v61, %v168_v51  ;;  %v201_v5 = vxor.u32 %v185_v62, %v169_v52  ;;  %v202_v20 = vxor.u32 %v186_v1, %v170_v55  ;;  %v203_v21 = vxor.u32 %v187_v3, %v171_v56 }
  0x44   :  { %v204_v22 = vxor.u32 %v188_v7, %v172_v59  ;;  %v205_v23 = vxor.u32 %v189_v8, %v173_v60  ;;  %v206_v24 = vxor.u32 %v190_v11, %v174_v63  ;;  %v207_v29 = vxor.u32 %v191_v12, %v175_v0 }
  0x45   :  { %vm208_vm0 = vcmp.ge.u32.totalorder %v192_v9, 429496730  ;;  %vm209_vm1 = vcmp.ge.u32.totalorder %v193_v10, 429496730  ;;  %vm210_vm2 = vcmp.ge.u32.totalorder %v194_v13, 429496730  ;;  %v249_v30 = vrot.slane %v549_v25, %v248_v37 }
  0x46   :  { %vm211_vm3 = vcmp.ge.u32.totalorder %v195_v14, 429496730  ;;  %vm212_vm4 = vcmp.ge.u32.totalorder %v196_v15, 429496730  ;;  %vm213_vm5 = vcmp.ge.u32.totalorder %v197_v16, 429496730  ;;  %v253_v31 = vrot.slane %v549_v25, %v252_v40 }
  0x47   :  { %vm214_vm6 = vcmp.ge.u32.totalorder %v198_v17, 429496730  ;;  %vm215_vm7 = vcmp.ge.u32.totalorder %v199_v18, 429496730  ;;  %vm216_vm8 = vcmp.ge.u32.totalorder %v200_v19, 429496730  ;;  %v265_v32 = vrot.slane %v551_v26, %v232_v27 }
  0x48   :  { %vm217_vm9 = vcmp.ge.u32.totalorder %v201_v5, 429496730  ;;  %vm218_vm10 = vcmp.ge.u32.totalorder %v202_v20, 429496730  ;;  %vm219_vm11 = vcmp.ge.u32.totalorder %v203_v21, 429496730  ;;  %v269_v35 = vrot.slane %v551_v26, %v236_v28 }
  0x49   :  { %vm220_vm12 = vcmp.ge.u32.totalorder %v204_v22, 429496730  ;;  %vm221_vm13 = vcmp.ge.u32.totalorder %v205_v23, 429496730  ;;  %vm222_vm14 = vcmp.ge.u32.totalorder %v206_v24, 429496730  ;;  %v273_v36 = vrot.slane %v551_v26, %v240_v42 }
  0x4a   :  { %vm223_vm15 = vcmp.ge.u32.totalorder %v207_v29, 429496730  ;;  %v256_v41 = vsub.s32 6, %v545_v4  ;;  %v260_v44 = vsub.s32 7, %v545_v4  ;;  %v277_v27 = vrot.slane %v551_v26, %v244_v43 }
  0x4b   :  { %v281_v28 = vrot.slane %v551_v26, %v248_v37  ;;  %v285_v45 = vrot.slane %v551_v26, %v252_v40  ;;  %v310_v42 = vsel %vm208_vm0, %v558_v38, 0.0  ;;  %v311_v46 = vsel %vm209_vm1, %v563_v39, 0.0 }
  0x4c   :  { %v257_v47 = vrot.slane %v549_v25, %v256_v41  ;;  %v261_v48 = vrot.slane %v549_v25, %v260_v44  ;;  %v289_v43 = vrot.slane %v551_v26, %v256_v41  ;;  %v293_v49 = vrot.slane %v551_v26, %v260_v44 }
  0x4d   :  { %v312_v37 = vsel %vm210_vm2, %v570_v33, 0.0  ;;  %v313_v40 = vsel %vm211_vm3, %v575_v34, 0.0  ;;  %v314_v50 = vsel %vm212_vm4, %v249_v30, 0.0  ;;  %v315_v38 = vsel %vm213_vm5, %v253_v31, 0.0 }
  0x4e   :  { %v316_v39 = vsel %vm214_vm6, %v257_v47, 0.0  ;;  %v317_v51 = vsel %vm215_vm7, %v261_v48, 0.0  ;;  %v318_v25 = vsel %vm216_vm8, %v265_v32, 0.0  ;;  %v319_v52 = vsel %vm217_vm9, %v269_v35, 0.0 }
  0x4f   :  { %v320_v26 = vsel %vm218_vm10, %v273_v36, 0.0  ;;  %v321_v53 = vsel %vm219_vm11, %v277_v27, 0.0  ;;  %v322_v33 = vsel %vm220_vm12, %v281_v28, 0.0  ;;  %v323_v34 = vsel %vm221_vm13, %v285_v45, 0.0 }
  0x50   :  { %v324_v54 = vsel %vm222_vm14, %v289_v43, 0.0  ;;  %v325_v55 = vsel %vm223_vm15, %v293_v49, 0.0  ;;  %v342_v56 = vcombine.low %v310_v42, %v311_v46  ;;  %v343_v57 = vcombine.low %v312_v37, %v313_v40 }
  0x51   :  { %v344_v58 = vcombine.low %v314_v50, %v315_v38  ;;  %v345_v59 = vcombine.low %v316_v39, %v317_v51  ;;  %v351_v60 = vsub.s32 %v348_v6, %v545_v4  ;;  %v391_v61 = vcombine.low %v318_v25, %v319_v52 }
  0x52   :  { %v392_v62 = vcombine.low %v320_v26, %v321_v53  ;;  %v393_v63 = vcombine.low %v322_v33, %v323_v34  ;;  %v394_v0 = vcombine.low %v324_v54, %v325_v55 }
  0x53   :  { %v352_v1 = vrot.slane %v342_v56, %v351_v60  ;;  %v359_v3 = vrot.slane %v343_v57, %v351_v60  ;;  %v366_v7 = vrot.slane %v344_v58, %v351_v60  ;;  %v373_v8 = vrot.slane %v345_v59, %v351_v60 }
  0x54   :  { %v401_v9 = vrot.slane %v391_v61, %v351_v60  ;;  %v408_v10 = vrot.slane %v392_v62, %v351_v60  ;;  %v415_v11 = vrot.slane %v393_v63, %v351_v60  ;;  %v422_v12 = vrot.slane %v394_v0, %v351_v60 }
  0x55   :  { %v374_v13 = vcombine.low %v352_v1, %v359_v3  ;;  %v375_v14 = vcombine.low %v366_v7, %v373_v8 }
  0x56   :  { %v423_v15 = vcombine.low %v401_v9, %v408_v10  ;;  %v424_v16 = vcombine.low %v415_v11, %v422_v12 }
  0x57   :  { %v382_v17 = vrot.slane %v374_v13, %v351_v60  ;;  %v389_v18 = vrot.slane %v375_v14, %v351_v60 }
  0x58   :  { %v431_v2 = vrot.slane %v423_v15, %v351_v60  ;;  %v438_v4 = vrot.slane %v424_v16, %v351_v60 }
  0x59   :  { %v390_v6 = vcombine.low %v382_v17, %v389_v18 }
  0x5a   :  { %v439_v19 = vcombine.low %v431_v2, %v438_v4 }
  0x5b   :  { %442 = vst [vmem:[#allocation7] sm:$0xff] %v390_v6 }
  0x5c   :  { %443 = vst [vmem:[#allocation7 + $0x8] sm:$0xff] %v439_v19 }
  0x5d   :  { %495 = shalt.err (!%p492_p12)
}
  0x5e   :  { %s496_s27 = scalar_lea.hbm %s646_s2, 256 }
  0x5f   :  { %p497_p13 = scmp.ne.s32.totalorder %s646_s2, %s496_s27  ;;  %p500_p0 = scmp.lt.u32.totalorder %s496_s27, %s646_s2 }
  0x61   :  { %p502_p1 = pnand %p500_p0, %p497_p13 }
  0x63   :  { %505 = shalt.err (!%p502_p1)
}
  0x64   :  { %453 = dma.vmem_to_hbm [thread:$0]  %s451_s1, 256, %s646_s2, [#allocation6]  }
  0x65   :  { %508 = dma.done.wait [#allocation6], 256  }
  0x66   :  { %509 = vsyncadd [#allocation6], 4294967040 }
  0x67   :  { %457 = vsyncpa [#allocation5], 1 }
  0x68   :  { %458 = vsyncpa [#allocation6], 1 }

</bundles_post_ra>
